<compile_context>
chip_gen: v7x
topology: tpu7x:2x2x1
jax: 0.10.0
libtpu: 0.0.40
codegen_flags: <defaults>
</compile_context>

<pallas_src>
import functools

import numpy as np
import jax
import jax.numpy as jnp
from jax.experimental import pallas as pl
from jax.experimental.pallas import tpu as pltpu


# Tap order matches w.reshape(9, C, C): t = kh*3 + kw, (dh, dw) = (kh-1, kw-1).
_TAP_OFFSETS = tuple((kh - 1, kw - 1) for kh in range(3) for kw in range(3))


def _tap_masks(H, W, nb):
    """(9, nb*H*W) f32 masks: 1.0 where the shifted source pixel lies inside the same
    image, 0.0 where the 3x3 conv reads zero padding (also zeroes reads that would
    leak into the neighbouring image or wrap around the slab)."""
    HW = H * W
    masks = np.zeros((9, HW), np.float32)
    for t, (dh, dw) in enumerate(_TAP_OFFSETS):
        m = np.zeros((H, W), np.float32)
        m[max(0, -dh):H - max(0, dh), max(0, -dw):W - max(0, dw)] = 1.0
        masks[t] = m.reshape(HW)
    return np.tile(masks, (1, nb))          # same per-image pattern, repeated nb times


def _stack_weights(w_hwio, b, C, C8, out_rows):
    """(3,3,C,C) HWIO weight + (C,) bias -> column-stacked (out_rows, 9*C8) matrix
    (tap-major / channel-minor columns, zero padding rows & cols) and (out_rows, 1)
    bias, matching the in-kernel stacked-operand row layout."""
    w_taps = jnp.transpose(jnp.reshape(w_hwio.astype(jnp.float32), (9, C, C)),
                           (0, 2, 1))                                   # (9, Cout, Cin)
    w_pad = jnp.zeros((9, out_rows, C8), jnp.float32).at[:, :C, :C].set(w_taps)
    w_flat = jnp.transpose(w_pad, (1, 0, 2)).reshape(out_rows, 9 * C8)
    b_pad = jnp.zeros((out_rows, 1), jnp.float32).at[:C, 0].set(b.astype(jnp.float32))
    return w_flat, b_pad


def _resnet_block_kernel(x_ref, embed_ref, w1_ref, b1_ref, w2_ref, b2_ref,
                         m_ref, o_ref, stack_ref, *, W):
    """One grid step == nb images flattened into one channel-major lane slab.

    x_ref    : (C, L)        L = nb*H*W, all nb images side by side in lanes
    embed_ref: (C8, C)       [I_C; 0] -- pads channels to a full 8-row group
    w*_ref   : (rows, 9*C8)  column-stacked conv weights (rows = C8 for conv1, C for conv2)
    b*_ref   : (rows, 1)     biases
    m_ref    : (9, L)        per-tap zero-padding / image-boundary masks
    o_ref    : (C, L)        output slab
    stack_ref: (9*C8, L)     VMEM scratch holding the stacked matmul operand
    """
    C, L = x_ref.shape
    C8 = embed_ref.shape[0]

    x = x_ref[...].astype(jnp.float32)                                     # (C, L)
    # Pad channels to 8 rows with a tiny MXU dot so every row-group written into the
    # stacked operand below is a full, tile-aligned (C8, L) store (no unaligned
    # sublane concatenation anywhere).
    x8 = jnp.dot(embed_ref[...], x, preferred_element_type=jnp.float32)    # (C8, L)

    def conv3x3(a8, w_ref, b_ref):
        # Build the (9*C8, L) stacked operand: nine masked lane-rolled taps, one
        # aligned 8-row store each, then contract with a SINGLE MXU dot.
        for t, (dh, dw) in enumerate(_TAP_OFFSETS):
            d = dh * W + dw
            s = a8 if d == 0 else pltpu.roll(a8, (-d) % L, 1)
            if (dh, dw) != (0, 0):
                s = s * m_ref[pl.ds(t, 1), :]       # zero padding / image boundary
            stack_ref[pl.ds(t * C8, C8), :] = s
        out = jnp.dot(w_ref[...], stack_ref[...],
                      preferred_element_type=jnp.float32)
        return out + b_ref[...]                     # one hoisted bias add per conv

    h1 = jnp.maximum(conv3x3(x8, w1_ref, b1_ref), 0.0)   # (C8, L); pad rows stay 0
    h2 = conv3x3(h1, w2_ref, b2_ref)                      # (C, L)
    o_ref[...] = jnp.maximum(h2 + x, 0.0).astype(o_ref.dtype)


def resnet_block(x_nchw, w1, b1, w2, b2, *, images_per_step=None):
    """Forward pass of ResNetBlock.

    x_nchw : (N, C, H, W)  PyTorch layout
    w1, w2 : (3, 3, C, C)  HWIO conv weights
    b1, b2 : (C,)          biases
    returns (N, C, H, W)
    """
    N, C, H, W = x_nchw.shape
    HW = H * W
    C8 = ((C + 7) // 8) * 8

    # Per-step batch block: 64 images => ~0.5 MiB of HBM traffic and ~12 MiB of VMEM
    # per step (the stacked-operand scratch, 9*C8*L*4 B, is the largest piece), which
    # fits v5e/v6e/v7x under the explicit 32 MiB scoped-VMEM limit below.  Raise both
    # together for very large batches if per-step overhead shows up in profiles.
    nb = 64 if images_per_step is None else images_per_step
    nb = max(1, min(nb, N))
    n_steps = pl.cdiv(N, nb)
    Npad = n_steps * nb
    L = nb * HW

    x = x_nchw.reshape(N, C, HW)
    if Npad != N:                                   # no divisibility assert: pad batch,
        x = jnp.pad(x, ((0, Npad - N), (0, 0), (0, 0)))   # slice the result afterwards
    # Channel-major lane slab (C, Npad*HW): layout plumbing so each grid step is one
    # lane-dense (C, nb*HW) block.
    x = jnp.transpose(x, (1, 0, 2)).reshape(C, Npad * HW)

    embed = jnp.asarray(np.eye(C8, C, dtype=np.float32))            # [I_C; 0]
    w1s, b1s = _stack_weights(w1, b1, C, C8, out_rows=C8)
    w2s, b2s = _stack_weights(w2, b2, C, C8, out_rows=C)
    masks = jnp.asarray(_tap_masks(H, W, nb))

    kernel = functools.partial(_resnet_block_kernel, W=W)
    out = pl.pallas_call(
        kernel,
        out_shape=jax.ShapeDtypeStruct((C, Npad * HW), x_nchw.dtype),
        grid_spec=pltpu.PrefetchScalarGridSpec(
            num_scalar_prefetch=0,
            grid=(n_steps,),
            in_specs=[
                pl.BlockSpec((C, L), lambda n: (0, n)),           # x slab
                pl.BlockSpec((C8, C), lambda n: (0, 0)),          # embed
                pl.BlockSpec((C8, 9 * C8), lambda n: (0, 0)),     # w1 (stacked)
                pl.BlockSpec((C8, 1), lambda n: (0, 0)),          # b1
                pl.BlockSpec((C, 9 * C8), lambda n: (0, 0)),      # w2 (stacked)
                pl.BlockSpec((C, 1), lambda n: (0, 0)),           # b2
                pl.BlockSpec((9, L), lambda n: (0, 0)),           # masks
            ],
            out_specs=pl.BlockSpec((C, L), lambda n: (0, n)),
            scratch_shapes=[pltpu.VMEM((9 * C8, L), jnp.float32)],
        ),
        compiler_params=pltpu.CompilerParams(
            dimension_semantics=("parallel",),
            vmem_limit_bytes=32 * 1024 * 1024),
    )(x, embed, w1s, b1s, w2s, b2s, masks)

    out = out.reshape(C, Npad, HW).transpose(1, 0, 2)[:N]
    return out.reshape(N, C, H, W)


def _reference(x_nchw, w1, b1, w2, b2):
    """Pure-JAX reference using lax.conv (NCHW / OIHW, same as PyTorch)."""
    w1_oihw = jnp.transpose(w1, (3, 2, 0, 1))
    w2_oihw = jnp.transpose(w2, (3, 2, 0, 1))
    dn = jax.lax.conv_dimension_numbers(x_nchw.shape, w1_oihw.shape,
                                        ('NCHW', 'OIHW', 'NCHW'))
    h = jax.lax.conv_general_dilated(x_nchw, w1_oihw, (1, 1), 'SAME',
                                     dimension_numbers=dn)
    h = jnp.maximum(h + b1.reshape(1, -1, 1, 1), 0.0)
    h = jax.lax.conv_general_dilated(h, w2_oihw, (1, 1), 'SAME',
                                     dimension_numbers=dn)
    h = h + b2.reshape(1, -1, 1, 1)
    return jnp.maximum(h + x_nchw, 0.0)


if __name__ == "__main__":
    N, C, H, W = 2, 4, 16, 16      # n_features = 4
    key = jax.random.PRNGKey(0)
    kx, k1, kb1, k2, kb2 = jax.random.split(key, 5)

    x = jax.random.normal(kx, (N, C, H, W), dtype=jnp.float32)
    # deterministic param init (synthetic; shapes match nn.Conv2d(C, C, 3))
    w1 = jax.random.normal(k1, (3, 3, C, C), dtype=jnp.float32) * 0.1
    b1 = jax.random.normal(kb1, (C,), dtype=jnp.float32) * 0.1
    w2 = jax.random.normal(k2, (3, 3, C, C), dtype=jnp.float32) * 0.1
    b2 = jax.random.normal(kb2, (C,), dtype=jnp.float32) * 0.1

    fwd = jax.jit(resnet_block)
    out = jax.block_until_ready(fwd(x, w1, b1, w2, b2))
    ref = jax.block_until_ready(_reference(x, w1, b1, w2, b2))
    assert out.shape == (N, C, H, W)
    assert jnp.allclose(out, ref, atol=1e-4, rtol=1e-4), "mismatch vs reference"

    # Also exercise the padded-batch / multi-step grid path (N not divisible by nb).
    x5 = jax.random.normal(jax.random.PRNGKey(1), (5, C, H, W), dtype=jnp.float32)
    out5 = jax.block_until_ready(resnet_block(x5, w1, b1, w2, b2, images_per_step=2))
    ref5 = jax.block_until_ready(_reference(x5, w1, b1, w2, b2))
    assert jnp.allclose(out5, ref5, atol=1e-4, rtol=1e-4), "mismatch (padded batch)"

    print("KERNEL_OK")
</pallas_src>

<mosaic_0001>
module attributes {stable_mosaic.version = 11 : i64} {
  func.func @_resnet_block_kernel(%arg0: i32, %arg1: memref<4x512xf32, #tpu.memory_space<vmem>>, %arg2: memref<8x4xf32, #tpu.memory_space<vmem>>, %arg3: memref<8x72xf32, #tpu.memory_space<vmem>>, %arg4: memref<8x1xf32, #tpu.memory_space<vmem>>, %arg5: memref<4x72xf32, #tpu.memory_space<vmem>>, %arg6: memref<4x1xf32, #tpu.memory_space<vmem>>, %arg7: memref<9x512xf32, #tpu.memory_space<vmem>>, %arg8: memref<4x512xf32, #tpu.memory_space<vmem>>, %arg9: memref<72x512xf32, #tpu.memory_space<vmem>>) attributes {dimension_semantics = [#tpu.dimension_semantics<parallel>], iteration_bounds = array<i64: 1>, scalar_prefetch = 0 : i64, scratch_operands = 1 : i64, tpu.core_type = #tpu.core_type<tc>, window_params = [{transform_indices = @transform_0, window_bounds = array<i64: 4, 512>}, {pipeline_mode = #tpu.pipeline_mode<synchronous>, transform_indices = @transform_1, window_bounds = array<i64: 8, 4>}, {pipeline_mode = #tpu.pipeline_mode<synchronous>, transform_indices = @transform_2, window_bounds = array<i64: 8, 72>}, {pipeline_mode = #tpu.pipeline_mode<synchronous>, transform_indices = @transform_3, window_bounds = array<i64: 8, 1>}, {pipeline_mode = #tpu.pipeline_mode<synchronous>, transform_indices = @transform_4, window_bounds = array<i64: 4, 72>}, {pipeline_mode = #tpu.pipeline_mode<synchronous>, transform_indices = @transform_5, window_bounds = array<i64: 4, 1>}, {pipeline_mode = #tpu.pipeline_mode<synchronous>, transform_indices = @transform_6, window_bounds = array<i64: 9, 512>}, {transform_indices = @transform_7, window_bounds = array<i64: 4, 512>}]} {
    %c0 = arith.constant 0 : index
    %c0_0 = arith.constant 0 : index
    %0 = vector.load %arg1[%c0, %c0_0] : memref<4x512xf32, #tpu.memory_space<vmem>>, vector<4x512xf32>
    %c0_1 = arith.constant 0 : index
    %c0_2 = arith.constant 0 : index
    %1 = vector.load %arg2[%c0_1, %c0_2] : memref<8x4xf32, #tpu.memory_space<vmem>>, vector<8x4xf32>
    %cst = arith.constant dense<0.000000e+00> : vector<8x512xf32>
    %2 = tpu.matmul %1, %0, %cst {dimension_numbers = #tpu.dot_dimension_numbers<[1], [0], [0], [1], [0, 0, 1, 1], [], []>} : vector<8x4xf32>, vector<4x512xf32>, vector<8x512xf32> -> vector<8x512xf32>
    %c17_i32 = arith.constant 17 : i32
    %3 = tpu.dynamic_rotate %2 by %c17_i32 dim 1 : vector<8x512xf32>, i32 -> vector<8x512xf32>
    %c0_3 = arith.constant 0 : index
    %c0_4 = arith.constant 0 : index
    %4 = vector.load %arg7[%c0_3, %c0_4] : memref<9x512xf32, #tpu.memory_space<vmem>>, vector<1x512xf32>
    %5 = vector.broadcast %4 : vector<1x512xf32> to vector<8x512xf32>
    %6 = arith.mulf %3, %5 : vector<8x512xf32>
    %c0_5 = arith.constant 0 : index
    %c0_6 = arith.constant 0 : index
    %7 = vector.load %arg9[%c0_5, %c0_6] : memref<72x512xf32, #tpu.memory_space<vmem>>, vector<8x512xf32>
    tpu.vector_store %arg9[%c0_5, %c0_6], %6 {strides = array<i32>} : memref<72x512xf32, #tpu.memory_space<vmem>>, vector<8x512xf32>,
    %c16_i32 = arith.constant 16 : i32
    %8 = tpu.dynamic_rotate %2 by %c16_i32 dim 1 : vector<8x512xf32>, i32 -> vector<8x512xf32>
    %c1 = arith.constant 1 : index
    %c0_7 = arith.constant 0 : index
    %9 = vector.load %arg7[%c1, %c0_7] : memref<9x512xf32, #tpu.memory_space<vmem>>, vector<1x512xf32>
    %10 = vector.broadcast %9 : vector<1x512xf32> to vector<8x512xf32>
    %11 = arith.mulf %8, %10 : vector<8x512xf32>
    %c8 = arith.constant 8 : index
    %c0_8 = arith.constant 0 : index
    %12 = vector.load %arg9[%c8, %c0_8] : memref<72x512xf32, #tpu.memory_space<vmem>>, vector<8x512xf32>
    tpu.vector_store %arg9[%c8, %c0_8], %11 {strides = array<i32>} : memref<72x512xf32, #tpu.memory_space<vmem>>, vector<8x512xf32>,
    %c15_i32 = arith.constant 15 : i32
    %13 = tpu.dynamic_rotate %2 by %c15_i32 dim 1 : vector<8x512xf32>, i32 -> vector<8x512xf32>
    %c2 = arith.constant 2 : index
    %c0_9 = arith.constant 0 : index
    %14 = vector.load %arg7[%c2, %c0_9] : memref<9x512xf32, #tpu.memory_space<vmem>>, vector<1x512xf32>
    %15 = vector.broadcast %14 : vector<1x512xf32> to vector<8x512xf32>
    %16 = arith.mulf %13, %15 : vector<8x512xf32>
    %c16 = arith.constant 16 : index
    %c0_10 = arith.constant 0 : index
    %17 = vector.load %arg9[%c16, %c0_10] : memref<72x512xf32, #tpu.memory_space<vmem>>, vector<8x512xf32>
    tpu.vector_store %arg9[%c16, %c0_10], %16 {strides = array<i32>} : memref<72x512xf32, #tpu.memory_space<vmem>>, vector<8x512xf32>,
    %c1_i32 = arith.constant 1 : i32
    %18 = tpu.dynamic_rotate %2 by %c1_i32 dim 1 : vector<8x512xf32>, i32 -> vector<8x512xf32>
    %c3 = arith.constant 3 : index
    %c0_11 = arith.constant 0 : index
    %19 = vector.load %arg7[%c3, %c0_11] : memref<9x512xf32, #tpu.memory_space<vmem>>, vector<1x512xf32>
    %20 = vector.broadcast %19 : vector<1x512xf32> to vector<8x512xf32>
    %21 = arith.mulf %18, %20 : vector<8x512xf32>
    %c24 = arith.constant 24 : index
    %c0_12 = arith.constant 0 : index
    %22 = vector.load %arg9[%c24, %c0_12] : memref<72x512xf32, #tpu.memory_space<vmem>>, vector<8x512xf32>
    tpu.vector_store %arg9[%c24, %c0_12], %21 {strides = array<i32>} : memref<72x512xf32, #tpu.memory_space<vmem>>, vector<8x512xf32>,
    %c32 = arith.constant 32 : index
    %c0_13 = arith.constant 0 : index
    %23 = vector.load %arg9[%c32, %c0_13] : memref<72x512xf32, #tpu.memory_space<vmem>>, vector<8x512xf32>
    tpu.vector_store %arg9[%c32, %c0_13], %2 {strides = array<i32>} : memref<72x512xf32, #tpu.memory_space<vmem>>, vector<8x512xf32>,
    %c511_i32 = arith.constant 511 : i32
    %24 = tpu.dynamic_rotate %2 by %c511_i32 dim 1 : vector<8x512xf32>, i32 -> vector<8x512xf32>
    %c5 = arith.constant 5 : index
    %c0_14 = arith.constant 0 : index
    %25 = vector.load %arg7[%c5, %c0_14] : memref<9x512xf32, #tpu.memory_space<vmem>>, vector<1x512xf32>
    %26 = vector.broadcast %25 : vector<1x512xf32> to vector<8x512xf32>
    %27 = arith.mulf %24, %26 : vector<8x512xf32>
    %c40 = arith.constant 40 : index
    %c0_15 = arith.constant 0 : index
    %28 = vector.load %arg9[%c40, %c0_15] : memref<72x512xf32, #tpu.memory_space<vmem>>, vector<8x512xf32>
    tpu.vector_store %arg9[%c40, %c0_15], %27 {strides = array<i32>} : memref<72x512xf32, #tpu.memory_space<vmem>>, vector<8x512xf32>,
    %c497_i32 = arith.constant 497 : i32
    %29 = tpu.dynamic_rotate %2 by %c497_i32 dim 1 : vector<8x512xf32>, i32 -> vector<8x512xf32>
    %c6 = arith.constant 6 : index
    %c0_16 = arith.constant 0 : index
    %30 = vector.load %arg7[%c6, %c0_16] : memref<9x512xf32, #tpu.memory_space<vmem>>, vector<1x512xf32>
    %31 = vector.broadcast %30 : vector<1x512xf32> to vector<8x512xf32>
    %32 = arith.mulf %29, %31 : vector<8x512xf32>
    %c48 = arith.constant 48 : index
    %c0_17 = arith.constant 0 : index
    %33 = vector.load %arg9[%c48, %c0_17] : memref<72x512xf32, #tpu.memory_space<vmem>>, vector<8x512xf32>
    tpu.vector_store %arg9[%c48, %c0_17], %32 {strides = array<i32>} : memref<72x512xf32, #tpu.memory_space<vmem>>, vector<8x512xf32>,
    %c496_i32 = arith.constant 496 : i32
    %34 = tpu.dynamic_rotate %2 by %c496_i32 dim 1 : vector<8x512xf32>, i32 -> vector<8x512xf32>
    %c7 = arith.constant 7 : index
    %c0_18 = arith.constant 0 : index
    %35 = vector.load %arg7[%c7, %c0_18] : memref<9x512xf32, #tpu.memory_space<vmem>>, vector<1x512xf32>
    %36 = vector.broadcast %35 : vector<1x512xf32> to vector<8x512xf32>
    %37 = arith.mulf %34, %36 : vector<8x512xf32>
    %c56 = arith.constant 56 : index
    %c0_19 = arith.constant 0 : index
    %38 = vector.load %arg9[%c56, %c0_19] : memref<72x512xf32, #tpu.memory_space<vmem>>, vector<8x512xf32>
    tpu.vector_store %arg9[%c56, %c0_19], %37 {strides = array<i32>} : memref<72x512xf32, #tpu.memory_space<vmem>>, vector<8x512xf32>,
    %c495_i32 = arith.constant 495 : i32
    %39 = tpu.dynamic_rotate %2 by %c495_i32 dim 1 : vector<8x512xf32>, i32 -> vector<8x512xf32>
    %c8_20 = arith.constant 8 : index
    %c0_21 = arith.constant 0 : index
    %40 = vector.load %arg7[%c8_20, %c0_21] : memref<9x512xf32, #tpu.memory_space<vmem>>, vector<1x512xf32>
    %41 = vector.broadcast %40 : vector<1x512xf32> to vector<8x512xf32>
    %42 = arith.mulf %39, %41 : vector<8x512xf32>
    %c64 = arith.constant 64 : index
    %c0_22 = arith.constant 0 : index
    %43 = vector.load %arg9[%c64, %c0_22] : memref<72x512xf32, #tpu.memory_space<vmem>>, vector<8x512xf32>
    tpu.vector_store %arg9[%c64, %c0_22], %42 {strides = array<i32>} : memref<72x512xf32, #tpu.memory_space<vmem>>, vector<8x512xf32>,
    %c0_23 = arith.constant 0 : index
    %c0_24 = arith.constant 0 : index
    %44 = vector.load %arg3[%c0_23, %c0_24] : memref<8x72xf32, #tpu.memory_space<vmem>>, vector<8x72xf32>
    %c0_25 = arith.constant 0 : index
    %c0_26 = arith.constant 0 : index
    %45 = vector.load %arg9[%c0_25, %c0_26] : memref<72x512xf32, #tpu.memory_space<vmem>>, vector<72x512xf32>
    %cst_27 = arith.constant dense<0.000000e+00> : vector<8x512xf32>
    %46 = tpu.matmul %44, %45, %cst_27 {dimension_numbers = #tpu.dot_dimension_numbers<[1], [0], [0], [1], [0, 0, 1, 1], [], []>} : vector<8x72xf32>, vector<72x512xf32>, vector<8x512xf32> -> vector<8x512xf32>
    %c0_28 = arith.constant 0 : index
    %c0_29 = arith.constant 0 : index
    %47 = vector.load %arg4[%c0_28, %c0_29] : memref<8x1xf32, #tpu.memory_space<vmem>>, vector<8x1xf32>
    %48 = vector.broadcast %47 : vector<8x1xf32> to vector<8x512xf32>
    %49 = arith.addf %46, %48 : vector<8x512xf32>
    %cst_30 = arith.constant 0.000000e+00 : f32
    %50 = vector.broadcast %cst_30 : f32 to vector<8x512xf32>
    %51 = arith.maximumf %49, %50 : vector<8x512xf32>
    %c17_i32_31 = arith.constant 17 : i32
    %52 = tpu.dynamic_rotate %51 by %c17_i32_31 dim 1 : vector<8x512xf32>, i32 -> vector<8x512xf32>
    %c0_32 = arith.constant 0 : index
    %c0_33 = arith.constant 0 : index
    %53 = vector.load %arg7[%c0_32, %c0_33] : memref<9x512xf32, #tpu.memory_space<vmem>>, vector<1x512xf32>
    %54 = vector.broadcast %53 : vector<1x512xf32> to vector<8x512xf32>
    %55 = arith.mulf %52, %54 : vector<8x512xf32>
    %c0_34 = arith.constant 0 : index
    %c0_35 = arith.constant 0 : index
    %56 = vector.load %arg9[%c0_34, %c0_35] : memref<72x512xf32, #tpu.memory_space<vmem>>, vector<8x512xf32>
    tpu.vector_store %arg9[%c0_34, %c0_35], %55 {strides = array<i32>} : memref<72x512xf32, #tpu.memory_space<vmem>>, vector<8x512xf32>,
    %c16_i32_36 = arith.constant 16 : i32
    %57 = tpu.dynamic_rotate %51 by %c16_i32_36 dim 1 : vector<8x512xf32>, i32 -> vector<8x512xf32>
    %c1_37 = arith.constant 1 : index
    %c0_38 = arith.constant 0 : index
    %58 = vector.load %arg7[%c1_37, %c0_38] : memref<9x512xf32, #tpu.memory_space<vmem>>, vector<1x512xf32>
    %59 = vector.broadcast %58 : vector<1x512xf32> to vector<8x512xf32>
    %60 = arith.mulf %57, %59 : vector<8x512xf32>
    %c8_39 = arith.constant 8 : index
    %c0_40 = arith.constant 0 : index
    %61 = vector.load %arg9[%c8_39, %c0_40] : memref<72x512xf32, #tpu.memory_space<vmem>>, vector<8x512xf32>
    tpu.vector_store %arg9[%c8_39, %c0_40], %60 {strides = array<i32>} : memref<72x512xf32, #tpu.memory_space<vmem>>, vector<8x512xf32>,
    %c15_i32_41 = arith.constant 15 : i32
    %62 = tpu.dynamic_rotate %51 by %c15_i32_41 dim 1 : vector<8x512xf32>, i32 -> vector<8x512xf32>
    %c2_42 = arith.constant 2 : index
    %c0_43 = arith.constant 0 : index
    %63 = vector.load %arg7[%c2_42, %c0_43] : memref<9x512xf32, #tpu.memory_space<vmem>>, vector<1x512xf32>
    %64 = vector.broadcast %63 : vector<1x512xf32> to vector<8x512xf32>
    %65 = arith.mulf %62, %64 : vector<8x512xf32>
    %c16_44 = arith.constant 16 : index
    %c0_45 = arith.constant 0 : index
    %66 = vector.load %arg9[%c16_44, %c0_45] : memref<72x512xf32, #tpu.memory_space<vmem>>, vector<8x512xf32>
    tpu.vector_store %arg9[%c16_44, %c0_45], %65 {strides = array<i32>} : memref<72x512xf32, #tpu.memory_space<vmem>>, vector<8x512xf32>,
    %c1_i32_46 = arith.constant 1 : i32
    %67 = tpu.dynamic_rotate %51 by %c1_i32_46 dim 1 : vector<8x512xf32>, i32 -> vector<8x512xf32>
    %c3_47 = arith.constant 3 : index
    %c0_48 = arith.constant 0 : index
    %68 = vector.load %arg7[%c3_47, %c0_48] : memref<9x512xf32, #tpu.memory_space<vmem>>, vector<1x512xf32>
    %69 = vector.broadcast %68 : vector<1x512xf32> to vector<8x512xf32>
    %70 = arith.mulf %67, %69 : vector<8x512xf32>
    %c24_49 = arith.constant 24 : index
    %c0_50 = arith.constant 0 : index
    %71 = vector.load %arg9[%c24_49, %c0_50] : memref<72x512xf32, #tpu.memory_space<vmem>>, vector<8x512xf32>
    tpu.vector_store %arg9[%c24_49, %c0_50], %70 {strides = array<i32>} : memref<72x512xf32, #tpu.memory_space<vmem>>, vector<8x512xf32>,
    %c32_51 = arith.constant 32 : index
    %c0_52 = arith.constant 0 : index
    %72 = vector.load %arg9[%c32_51, %c0_52] : memref<72x512xf32, #tpu.memory_space<vmem>>, vector<8x512xf32>
    tpu.vector_store %arg9[%c32_51, %c0_52], %51 {strides = array<i32>} : memref<72x512xf32, #tpu.memory_space<vmem>>, vector<8x512xf32>,
    %c511_i32_53 = arith.constant 511 : i32
    %73 = tpu.dynamic_rotate %51 by %c511_i32_53 dim 1 : vector<8x512xf32>, i32 -> vector<8x512xf32>
    %c5_54 = arith.constant 5 : index
    %c0_55 = arith.constant 0 : index
    %74 = vector.load %arg7[%c5_54, %c0_55] : memref<9x512xf32, #tpu.memory_space<vmem>>, vector<1x512xf32>
    %75 = vector.broadcast %74 : vector<1x512xf32> to vector<8x512xf32>
    %76 = arith.mulf %73, %75 : vector<8x512xf32>
    %c40_56 = arith.constant 40 : index
    %c0_57 = arith.constant 0 : index
    %77 = vector.load %arg9[%c40_56, %c0_57] : memref<72x512xf32, #tpu.memory_space<vmem>>, vector<8x512xf32>
    tpu.vector_store %arg9[%c40_56, %c0_57], %76 {strides = array<i32>} : memref<72x512xf32, #tpu.memory_space<vmem>>, vector<8x512xf32>,
    %c497_i32_58 = arith.constant 497 : i32
    %78 = tpu.dynamic_rotate %51 by %c497_i32_58 dim 1 : vector<8x512xf32>, i32 -> vector<8x512xf32>
    %c6_59 = arith.constant 6 : index
    %c0_60 = arith.constant 0 : index
    %79 = vector.load %arg7[%c6_59, %c0_60] : memref<9x512xf32, #tpu.memory_space<vmem>>, vector<1x512xf32>
    %80 = vector.broadcast %79 : vector<1x512xf32> to vector<8x512xf32>
    %81 = arith.mulf %78, %80 : vector<8x512xf32>
    %c48_61 = arith.constant 48 : index
    %c0_62 = arith.constant 0 : index
    %82 = vector.load %arg9[%c48_61, %c0_62] : memref<72x512xf32, #tpu.memory_space<vmem>>, vector<8x512xf32>
    tpu.vector_store %arg9[%c48_61, %c0_62], %81 {strides = array<i32>} : memref<72x512xf32, #tpu.memory_space<vmem>>, vector<8x512xf32>,
    %c496_i32_63 = arith.constant 496 : i32
    %83 = tpu.dynamic_rotate %51 by %c496_i32_63 dim 1 : vector<8x512xf32>, i32 -> vector<8x512xf32>
    %c7_64 = arith.constant 7 : index
    %c0_65 = arith.constant 0 : index
    %84 = vector.load %arg7[%c7_64, %c0_65] : memref<9x512xf32, #tpu.memory_space<vmem>>, vector<1x512xf32>
    %85 = vector.broadcast %84 : vector<1x512xf32> to vector<8x512xf32>
    %86 = arith.mulf %83, %85 : vector<8x512xf32>
    %c56_66 = arith.constant 56 : index
    %c0_67 = arith.constant 0 : index
    %87 = vector.load %arg9[%c56_66, %c0_67] : memref<72x512xf32, #tpu.memory_space<vmem>>, vector<8x512xf32>
    tpu.vector_store %arg9[%c56_66, %c0_67], %86 {strides = array<i32>} : memref<72x512xf32, #tpu.memory_space<vmem>>, vector<8x512xf32>,
    %c495_i32_68 = arith.constant 495 : i32
    %88 = tpu.dynamic_rotate %51 by %c495_i32_68 dim 1 : vector<8x512xf32>, i32 -> vector<8x512xf32>
    %c8_69 = arith.constant 8 : index
    %c0_70 = arith.constant 0 : index
    %89 = vector.load %arg7[%c8_69, %c0_70] : memref<9x512xf32, #tpu.memory_space<vmem>>, vector<1x512xf32>
    %90 = vector.broadcast %89 : vector<1x512xf32> to vector<8x512xf32>
    %91 = arith.mulf %88, %90 : vector<8x512xf32>
    %c64_71 = arith.constant 64 : index
    %c0_72 = arith.constant 0 : index
    %92 = vector.load %arg9[%c64_71, %c0_72] : memref<72x512xf32, #tpu.memory_space<vmem>>, vector<8x512xf32>
    tpu.vector_store %arg9[%c64_71, %c0_72], %91 {strides = array<i32>} : memref<72x512xf32, #tpu.memory_space<vmem>>, vector<8x512xf32>,
    %c0_73 = arith.constant 0 : index
    %c0_74 = arith.constant 0 : index
    %93 = vector.load %arg5[%c0_73, %c0_74] : memref<4x72xf32, #tpu.memory_space<vmem>>, vector<4x72xf32>
    %c0_75 = arith.constant 0 : index
    %c0_76 = arith.constant 0 : index
    %94 = vector.load %arg9[%c0_75, %c0_76] : memref<72x512xf32, #tpu.memory_space<vmem>>, vector<72x512xf32>
    %cst_77 = arith.constant dense<0.000000e+00> : vector<4x512xf32>
    %95 = tpu.matmul %93, %94, %cst_77 {dimension_numbers = #tpu.dot_dimension_numbers<[1], [0], [0], [1], [0, 0, 1, 1], [], []>} : vector<4x72xf32>, vector<72x512xf32>, vector<4x512xf32> -> vector<4x512xf32>
    %c0_78 = arith.constant 0 : index
    %c0_79 = arith.constant 0 : index
    %96 = vector.load %arg6[%c0_78, %c0_79] : memref<4x1xf32, #tpu.memory_space<vmem>>, vector<4x1xf32>
    %97 = vector.broadcast %96 : vector<4x1xf32> to vector<4x512xf32>
    %98 = arith.addf %95, %97 : vector<4x512xf32>
    %99 = arith.addf %98, %0 : vector<4x512xf32>
    %cst_80 = arith.constant 0.000000e+00 : f32
    %100 = vector.broadcast %cst_80 : f32 to vector<4x512xf32>
    %101 = arith.maximumf %99, %100 : vector<4x512xf32>
    %c0_81 = arith.constant 0 : index
    %c0_82 = arith.constant 0 : index
    %102 = vector.load %arg8[%c0_81, %c0_82] : memref<4x512xf32, #tpu.memory_space<vmem>>, vector<4x512xf32>
    tpu.vector_store %arg8[%c0_81, %c0_82], %101 {strides = array<i32>} : memref<4x512xf32, #tpu.memory_space<vmem>>, vector<4x512xf32>,
    return
  }
  func.func @transform_0(%arg0: i32) -> (i32, i32) {
    %c0_i32 = arith.constant 0 : i32
    %c0_i32_0 = arith.constant 0 : i32
    return %c0_i32, %arg0 : i32, i32
  }
  func.func @transform_1(%arg0: i32) -> (i32, i32) {
    %c0_i32 = arith.constant 0 : i32
    %c0_i32_0 = arith.constant 0 : i32
    %c0_i32_1 = arith.constant 0 : i32
    return %c0_i32, %c0_i32_0 : i32, i32
  }
  func.func @transform_2(%arg0: i32) -> (i32, i32) {
    %c0_i32 = arith.constant 0 : i32
    %c0_i32_0 = arith.constant 0 : i32
    %c0_i32_1 = arith.constant 0 : i32
    return %c0_i32, %c0_i32_0 : i32, i32
  }
  func.func @transform_3(%arg0: i32) -> (i32, i32) {
    %c0_i32 = arith.constant 0 : i32
    %c0_i32_0 = arith.constant 0 : i32
    %c0_i32_1 = arith.constant 0 : i32
    return %c0_i32, %c0_i32_0 : i32, i32
  }
  func.func @transform_4(%arg0: i32) -> (i32, i32) {
    %c0_i32 = arith.constant 0 : i32
    %c0_i32_0 = arith.constant 0 : i32
    %c0_i32_1 = arith.constant 0 : i32
    return %c0_i32, %c0_i32_0 : i32, i32
  }
  func.func @transform_5(%arg0: i32) -> (i32, i32) {
    %c0_i32 = arith.constant 0 : i32
    %c0_i32_0 = arith.constant 0 : i32
    %c0_i32_1 = arith.constant 0 : i32
    return %c0_i32, %c0_i32_0 : i32, i32
  }
  func.func @transform_6(%arg0: i32) -> (i32, i32) {
    %c0_i32 = arith.constant 0 : i32
    %c0_i32_0 = arith.constant 0 : i32
    %c0_i32_1 = arith.constant 0 : i32
    return %c0_i32, %c0_i32_0 : i32, i32
  }
  func.func @transform_7(%arg0: i32) -> (i32, i32) {
    %c0_i32 = arith.constant 0 : i32
    %c0_i32_0 = arith.constant 0 : i32
    return %c0_i32, %arg0 : i32, i32
  }
}

</mosaic_0001>

<bundles_post_ra>
// kernel: resnet_block.1
= control target key start
LH: loop header
LB: loop body
LE: loop exit
PB: predicated region body
PF: predicated region fallthrough
CT: control target
= control target key end

     0   :  { %vm37_vm0 = vcmask 1043456   ;;  %v1391_v2 = vmov 0.0   ;;  %vm33_vm1 = vcmask 31744   ;;  %s1394_s30 = smov 15   ;;  %s1395_s8 = smov 1   ;;  %v1399_v10 = vmov 0   ;;  %s1977_s0 = inlined_call_operand.vmem [shape: f32[4,512], index: 0, kind: input, shape index: {}]   ;;  %s1978_s1 = inlined_call_operand.vmem [shape: f32[8,4], index: 1, kind: input, shape index: {}]   ;;  %s1979_s3 = inlined_call_operand.vmem [shape: f32[8,1], index: 3, kind: input, shape index: {}]   ;;  %s1980_s6 = inlined_call_operand.vmem [shape: f32[9,512], index: 6, kind: input, shape index: {}]   ;;  %s1981_s2 = inlined_call_operand.vmem [shape: f32[8,72], index: 2, kind: input, shape index: {}]   ;;  %s1982_s5 = inlined_call_operand.vmem [shape: f32[4,1], index: 5, kind: input, shape index: {}]   ;;  %s1983_s4 = inlined_call_operand.vmem [shape: f32[4,72], index: 4, kind: input, shape index: {}]   ;;  %s1984_s7 = inlined_call_operand.vmem [shape: f32[4,512], index: 7, kind: output, shape index: {}]  }
   0x1   :  { %v1444_v0 = vld [vmem:[%s1977_s0] sm:$0xff]  ;;  %v1449_v1 = vld [vmem:[%s1977_s0 + $0x8] sm:$0xff]  ;;  %110 = vmatprep.mubr.f32.mxu0 %v1391_v2  ;;  %181 = vmatprep.mubr.f32.mxu1 %v1391_v2  ;;  %s1392_s0 = smov 17   ;;  %s1396_s9 = smov 127   ;;  %v196_v12 = vlaneseq  ;;  %vm588_vm10 = vcmask 588800  }
   0x2   :  { %v1455_v3 = vcombine.high %v1444_v0, %v1444_v0  ;;  %v1459_v4 = vcombine.high %v1449_v1, %v1449_v1  ;;  %v28_v5 = vld [vmem:[%s1978_s1] sm:$0xff]  ;;  %s1393_s1 = smov 16   ;;  %s1397_s10 = smov 113   ;;  %1388 = vset.pattern.permute.xlu0 %v1399_v10 }
   0x3   :  { %s1398_s11 = smov 112   ;;  %s1400_s12 = smov 111   ;;  %v582_v11 = vld [vmem:[%s1979_s3] sm:$0xff]  ;;  %v206_v15 = vshrl.u32 %v196_v12, 7  ;;  %v1549_v16 = vand.u32 127, %v196_v12 }
   0x4   :  { %1290 = vmatprep.subr.msk.mxu0 %vm37_vm0, %v1455_v3  ;;  %1293 = vmatprep.subr.msk.mxu1 %vm37_vm0, %v1459_v4  ;;  %v1556_v20 = vld [vmem:[%s1980_s6] ss:$8 sm:$0xf]  ;;  %v1562_v23 = vld [vmem:[%s1980_s6 + $0x1] ss:$8 sm:$0xf] }
   0x5   :  { %1291 = vmatpush1.msk.msra.mxu0 %vm37_vm0, %v1444_v0  ;;  %1294 = vmatpush1.msk.msra.mxu1 %vm37_vm0, %v1449_v1  ;;  %v1551_v19 = vsub.s32 3, %v206_v15  ;;  %vm198_vm2 = vcmp.lt.s32.totalorder %v1549_v16, 17  ;;  %vm241_vm3 = vcmp.lt.s32.totalorder %v1549_v16, 16  ;;  %v1578_v39 = vsub.s32 0, %v206_v15 }
   0x6   :  { %1292 = vmatmul.mubr.msk.f32.vlgmr.msra.gmra.mrb[0].mxu0 %vm33_vm1, %v28_v5  ;;  %1295 = vmatmul.mubr.msk.f32.vlgmr.msra.gmra.mrb[0].mxu1 %vm33_vm1, %v28_v5  ;;  %v1580_v40 = vsub.s32 1, %v206_v15  ;;  %v1582_v41 = vsub.s32 2, %v206_v15  ;;  %v1589_v44 = vld [vmem:[%s1980_s6 + $0x2] ss:$8 sm:$0xf]  ;;  %vm285_vm4 = vcmp.lt.s32.totalorder %v1549_v16, 15 }
   0x7   :  { %656 = vmatprep.mubr.f32.mxu0 %v1391_v2  ;;  %727 = vmatprep.mubr.f32.mxu1 %v1391_v2  ;;  %v220_v24 = vrot.slane %v1556_v20, %v1551_v19  ;;  %v264_v25 = vrot.slane %v1562_v23, %v1551_v19  ;;  %v208_v45 = vrot.slane %v1556_v20, %v1578_v39  ;;  %v1598_v47 = vld [vmem:[%s1980_s6 + $0x3] ss:$8 sm:$0xf]  ;;  %v1618_v57 = vld [vmem:[%s1980_s6 + $0x5] ss:$8 sm:$0xf] }
   0x8   :  { %v252_v46 = vrot.slane %v1562_v23, %v1578_v39  ;;  %v256_v48 = vrot.slane %v1562_v23, %v1580_v40  ;;  %v260_v49 = vrot.slane %v1562_v23, %v1582_v41  ;;  %v300_v53 = vrot.slane %v1589_v44, %v1580_v40 }
   0x9   :  { %v304_v54 = vrot.slane %v1589_v44, %v1582_v41  ;;  %v296_v55 = vrot.slane %v1589_v44, %v1578_v39  ;;  %v308_v56 = vrot.slane %v1589_v44, %v1551_v19  ;;  %vm329_vm5 = vcmp.lt.s32.totalorder %v1549_v16, 1 }
   0xa   :  { %v344_v59 = vrot.slane %v1598_v47, %v1580_v40  ;;  %v348_v60 = vrot.slane %v1598_v47, %v1582_v41  ;;  %v340_v62 = vrot.slane %v1598_v47, %v1578_v39  ;;  %v352_v63 = vrot.slane %v1598_v47, %v1551_v19 }
   0xb   :  { %vm377_vm6 = vcmp.lt.s32.totalorder %v1549_v16, 127  ;;  %v392_v12 = vrot.slane %v1618_v57, %v1580_v40  ;;  %vm421_vm7 = vcmp.lt.s32.totalorder %v1549_v16, 113  ;;  %vm465_vm8 = vcmp.lt.s32.totalorder %v1549_v16, 112 }
   0xc   :  { %vm509_vm9 = vcmp.lt.s32.totalorder %v1549_v16, 111 }
  0xd9   :  { %v1470_v6 = vpop.f32.mrb[0].mxu0  ;;  %v1472_v7 = vpop.f32.mrb[0].mxu1 }
  0xda   :  { %192 = vrot.lane.b32.xlu1 %v1472_v7, %s1392_s0  ;;  %188 = vrot.lane.b32.xlu0 %v1470_v6, %s1392_s0  ;;  %v1478_v8 = vpop.f32.mrb[1].mxu0  ;;  %v1480_v9 = vpop.f32.mrb[1].mxu1 }
  0xde   :  { %194 = vrot.lane.b32.xlu1 %v1480_v9, %s1392_s0  ;;  %233 = vrot.lane.b32.xlu0 %v1470_v6, %s1393_s1 }
  0xe2   :  { %237 = vrot.lane.b32.xlu0 %v1472_v7, %s1393_s1  ;;  %235 = vrot.lane.b32.xlu1 %v1478_v8, %s1393_s1 }
  0xe6   :  { %277 = vrot.lane.b32.xlu0 %v1470_v6, %s1394_s30  ;;  %239 = vrot.lane.b32.xlu1 %v1480_v9, %s1393_s1 }
  0xea   :  { %281 = vrot.lane.b32.xlu0 %v1472_v7, %s1394_s30  ;;  %279 = vrot.lane.b32.xlu1 %v1478_v8, %s1394_s30 }
  0xee   :  { %321 = vrot.lane.b32.xlu0 %v1470_v6, %s1395_s8  ;;  %283 = vrot.lane.b32.xlu1 %v1480_v9, %s1394_s30 }
  0xf2   :  { %325 = vrot.lane.b32.xlu0 %v1472_v7, %s1395_s8  ;;  %323 = vrot.lane.b32.xlu1 %v1478_v8, %s1395_s8 }
  0xf6   :  { %369 = vrot.lane.b32.xlu0 %v1470_v6, %s1396_s9  ;;  %327 = vrot.lane.b32.xlu1 %v1480_v9, %s1395_s8 }
  0xfa   :  { %373 = vrot.lane.b32.xlu0 %v1472_v7, %s1396_s9  ;;  %371 = vrot.lane.b32.xlu1 %v1478_v8, %s1396_s9 }
  0xfe   :  { %413 = vrot.lane.b32.xlu0 %v1470_v6, %s1397_s10  ;;  %375 = vrot.lane.b32.xlu1 %v1480_v9, %s1396_s9 }
 0x102   :  { %415 = vrot.lane.b32.xlu1 %v1478_v8, %s1397_s10  ;;  %190 = vrot.lane.b32.xlu0 %v1478_v8, %s1392_s0 }
 0x106   :  { %419 = vrot.lane.b32.xlu1 %v1480_v9, %s1397_s10  ;;  %417 = vrot.lane.b32.xlu0 %v1472_v7, %s1397_s10 }
 0x10a   :  { %459 = vrot.lane.b32.xlu1 %v1478_v8, %s1398_s11  ;;  %457 = vrot.lane.b32.xlu0 %v1470_v6, %s1398_s11 }
 0x10e   :  { %463 = vrot.lane.b32.xlu1 %v1480_v9, %s1398_s11  ;;  %461 = vrot.lane.b32.xlu0 %v1472_v7, %s1398_s11 }
 0x112   :  { %503 = vrot.lane.b32.xlu1 %v1478_v8, %s1400_s12  ;;  %501 = vrot.lane.b32.xlu0 %v1470_v6, %s1400_s12 }
 0x116   :  { %507 = vrot.lane.b32.xlu1 %v1480_v9, %s1400_s12  ;;  %505 = vrot.lane.b32.xlu0 %v1472_v7, %s1400_s12 }
 0x11a   :  { %585 = vperm.xlu0 %1388, %v582_v11   ;;  %v388_v11 = vrot.slane %v1618_v57, %v1578_v39 }
 0x14c   :  { %v1545_v13 = vpop.permute.xlu1 %192  ;;  %v1547_v14 = vpop.permute.xlu0 %188 }
 0x150   :  { %v195_v17 = vpop.permute.xlu1 %194  ;;  %v234_v18 = vpop.permute.xlu0 %233 }
 0x151   :  { %v199_v26 = vsel %vm198_vm2, %v1545_v13, %v195_v17  ;;  %v202_v58 = vsel %vm198_vm2, %v195_v17, %v1547_v14 }
 0x152   :  { %v228_v30 = vmul.f32 %v220_v24, %v199_v26  ;;  %v225_v23 = vmul.f32 %v208_v45, %v202_v58  ;;  %v396_v24 = vrot.slane %v1618_v57, %v1582_v41 }
 0x154   :  { %v238_v21 = vpop.permute.xlu0 %237  ;;  %v236_v22 = vpop.permute.xlu1 %235 }
 0x155   :  { %v243_v5 = vsel %vm241_vm3, %v236_v22, %v238_v21  ;;  %v244_v10 = vsel %vm241_vm3, %v234_v18, %v236_v22 }
 0x158   :  { %v1572_v27 = vpop.permute.xlu0 %277  ;;  %v240_v28 = vpop.permute.xlu1 %239 }
 0x159   :  { %v242_v29 = vsel %vm241_vm3, %v238_v21, %v240_v28  ;;  %v245_v50 = vsel %vm241_vm3, %v240_v28, %v234_v18  ;;  %v1650_v18 = vld [vmem:[%s1980_s6 + $0x6] ss:$8 sm:$0xf]  ;;  %v212_v21 = vrot.slane %v1556_v20, %v1580_v40  ;;  %v216_v28 = vrot.slane %v1556_v20, %v1582_v41 }
 0x15a   :  { %v272_v31 = vmul.f32 %v264_v25, %v242_v29  ;;  %v269_v61 = vmul.f32 %v252_v46, %v245_v50  ;;  %v400_v25 = vrot.slane %v1618_v57, %v1551_v19  ;;  %v444_v29 = vrot.slane %v1650_v18, %v1551_v19 }
 0x15b   :  { %v436_v45 = vrot.slane %v1650_v18, %v1580_v40 }
 0x15c   :  { %v282_v32 = vpop.permute.xlu0 %281  ;;  %v280_v33 = vpop.permute.xlu1 %279  ;;  %v1330_v34 = vpack.c.bf16 %v272_v31, %v228_v30  ;;  %v270_v30 = vmul.f32 %v256_v48, %v244_v10  ;;  %v271_v31 = vmul.f32 %v260_v49, %v243_v5 }
 0x15d   :  { %v287_v46 = vsel %vm285_vm4, %v280_v33, %v282_v32  ;;  %v288_v47 = vsel %vm285_vm4, %v1572_v27, %v280_v33 }
 0x15e   :  { %1331 = vmatprep.subr.bf16.mxu1 %v1330_v34  ;;  %v1316_v34 = vpack.c.bf16 %v269_v61, %v225_v23  ;;  %v314_v10 = vmul.f32 %v300_v53, %v288_v47 }
 0x160   :  { %v322_v35 = vpop.permute.xlu0 %321  ;;  %v1576_v36 = vpop.permute.xlu1 %283 }
 0x161   :  { %v286_v20 = vsel %vm285_vm4, %v282_v32, %v1576_v36 }
 0x164   :  { %v326_v37 = vpop.permute.xlu0 %325  ;;  %v324_v38 = vpop.permute.xlu1 %323 }
 0x165   :  { %v332_v22 = vsel %vm329_vm5, %v322_v35, %v324_v38  ;;  %v331_v50 = vsel %vm329_vm5, %v324_v38, %v326_v37 }
 0x166   :  { %v358_v57 = vmul.f32 %v344_v59, %v332_v22  ;;  %v289_v59 = vsel %vm285_vm4, %v1576_v36, %v1572_v27  ;;  %v1301_v27 = vld [vmem:[%s1980_s6 + $0x7] ss:$8 sm:$0xf]  ;;  %v315_v36 = vmul.f32 %v304_v54, %v287_v46 }
 0x167   :  { %v480_v46 = vrot.slane %v1301_v27, %v1580_v40 }
 0x168   :  { %v1584_v42 = vpop.permute.xlu0 %369  ;;  %v328_v43 = vpop.permute.xlu1 %327 }
 0x169   :  { %v330_v26 = vsel %vm329_vm5, %v326_v37, %v328_v43  ;;  %v333_v33 = vsel %vm329_vm5, %v328_v43, %v322_v35 }
 0x16a   :  { %v360_v58 = vmul.f32 %v352_v63, %v330_v26  ;;  %v357_v26 = vmul.f32 %v340_v62, %v333_v33 }
 0x16c   :  { %v374_v51 = vpop.permute.xlu0 %373  ;;  %v372_v52 = vpop.permute.xlu1 %371 }
 0x16d   :  { %v379_v63 = vsel %vm377_vm6, %v372_v52, %v374_v51  ;;  %v380_v35 = vsel %vm377_vm6, %v1584_v42, %v372_v52  ;;  %v313_v52 = vmul.f32 %v296_v55, %v289_v59  ;;  %v1302_v59 = vld [vmem:[%s1980_s6 + $0x20] ss:$8 sm:$0xf] }
 0x170   :  { %v1641_v15 = vpop.permute.xlu0 %413  ;;  %v376_v17 = vpop.permute.xlu1 %375 }
 0x171   :  { %v381_v32 = vsel %vm377_vm6, %v376_v17, %v1584_v42  ;;  %v378_v53 = vsel %vm377_vm6, %v374_v51, %v376_v17  ;;  %v1318_v42 = vpack.c.bf16 %v358_v57, %v314_v10  ;;  %v440_v51 = vrot.slane %v1650_v18, %v1582_v41 }
 0x172   :  { %v407_v54 = vmul.f32 %v396_v24, %v378_v53  ;;  %v476_v17 = vrot.slane %v1301_v27, %v1578_v39 }
 0x174   :  { %v416_v48 = vpop.permute.xlu1 %415  ;;  %v191_v49 = vpop.permute.xlu0 %190 }
 0x175   :  { %v200_v61 = vsel %vm198_vm2, %v191_v49, %v1545_v13  ;;  %v201_v5 = vsel %vm198_vm2, %v1547_v14, %v191_v49  ;;  %v316_v13 = vmul.f32 %v308_v56, %v286_v20  ;;  %v359_v14 = vmul.f32 %v348_v60, %v331_v50 }
 0x176   :  { %v226_v37 = vmul.f32 %v212_v21, %v201_v5  ;;  %v227_v38 = vmul.f32 %v216_v28, %v200_v61  ;;  %v408_v28 = vmul.f32 %v400_v25, %v381_v32  ;;  %v406_v56 = vmul.f32 %v392_v12, %v379_v63 }
 0x177   :  { %v1334_v47 = vpack.c.bf16 %v360_v58, %v316_v13  ;;  %v405_v60 = vmul.f32 %v388_v11, %v380_v35  ;;  %v1336_v62 = vpack.c.bf16 %v359_v14, %v315_v36  ;;  %v484_v20 = vrot.slane %v1301_v27, %v1582_v41 }
 0x178   :  { %v1332_v43 = vpack.c.bf16 %v271_v31, %v227_v38  ;;  %v420_v23 = vpop.permute.xlu1 %419  ;;  %v418_v22 = vpop.permute.xlu0 %417  ;;  %v1314_v21 = vpack.c.bf16 %v270_v30, %v226_v37  ;;  %v488_v30 = vrot.slane %v1301_v27, %v1551_v19  ;;  %v1320_v31 = vpack.c.bf16 %v357_v26, %v313_v52 }
 0x179   :  { %v425_v44 = vsel %vm421_vm7, %v420_v23, %v1641_v15  ;;  %v423_v55 = vsel %vm421_vm7, %v416_v48, %v418_v22  ;;  %v1338_v11 = vpack.c.bf16 %v408_v28, %v1480_v9  ;;  %v1324_v50 = vpack.c.bf16 %v405_v60, %v1470_v6 }
 0x17a   :  { %1315 = vmatprep.subr.bf16.mxu0 %v1314_v21  ;;  %1333 = vmatpush1.bf16.msra.mxu1 %v1332_v43  ;;  %v432_v49 = vrot.slane %v1650_v18, %v1578_v39  ;;  %v422_v57 = vsel %vm421_vm7, %v418_v22, %v420_v23  ;;  %v1340_v9 = vpack.c.bf16 %v407_v54, %v1472_v7 }
 0x17b   :  { %1317 = vmatpush1.bf16.msra.mxu0 %v1316_v34  ;;  %1335 = vmatprep.subr.bf16.mxu1 %v1334_v47  ;;  %v1322_v34 = vpack.c.bf16 %v406_v56, %v1478_v8  ;;  %v424_v8 = vsel %vm421_vm7, %v1641_v15, %v416_v48  ;;  %v452_v58 = vmul.f32 %v444_v29, %v425_v44 }
 0x17c   :  { %v460_v12 = vpop.permute.xlu1 %459  ;;  %1319 = vmatprep.subr.bf16.mxu0 %v1318_v42  ;;  %v458_v25 = vpop.permute.xlu0 %457  ;;  %v450_v6 = vmul.f32 %v436_v45, %v423_v55  ;;  %v451_v48 = vmul.f32 %v440_v51, %v422_v57  ;;  %v449_v18 = vmul.f32 %v432_v49, %v424_v8  ;;  %v532_v43 = vrot.slane %v1302_v59, %v1551_v19  ;;  %v545_v51 = vld [vmem:[%s1981_s2] sm:$0xff] }
 0x17d   :  { %v468_v24 = vsel %vm465_vm8, %v458_v25, %v460_v12  ;;  %v524_v23 = vrot.slane %v1302_v59, %v1580_v40  ;;  %v528_v22 = vrot.slane %v1302_v59, %v1582_v41  ;;  %v520_v21 = vrot.slane %v1302_v59, %v1578_v39  ;;  %v1305_v8 = vld [vmem:[%s1980_s6 + $0x1] ss:$8 sm:$0xf] }
 0x17e   :  { %1337 = vmatpush1.bf16.msra.mxu1 %v1336_v62  ;;  %v493_v33 = vmul.f32 %v476_v17, %v468_v24  ;;  %v809_v59 = vrot.slane %v1305_v8, %v1551_v19 }
 0x17f   :  { %1321 = vmatpush1.bf16.msra.mxu0 %v1320_v31  ;;  %1339 = vmatprep.subr.bf16.mxu1 %v1338_v11 }
 0x180   :  { %v464_v61 = vpop.permute.xlu1 %463  ;;  %1323 = vmatprep.subr.bf16.mxu0 %v1322_v34  ;;  %v462_v5 = vpop.permute.xlu0 %461  ;;  %v1328_v35 = vpack.c.bf16 %v493_v33, %v449_v18 }
 0x181   :  { %v469_v32 = vsel %vm465_vm8, %v464_v61, %v458_v25  ;;  %v466_v7 = vsel %vm465_vm8, %v462_v5, %v464_v61  ;;  %v467_v15 = vsel %vm465_vm8, %v460_v12, %v462_v5  ;;  %v801_v5 = vrot.slane %v1305_v8, %v1580_v40 }
 0x182   :  { %v496_v37 = vmul.f32 %v488_v30, %v469_v32  ;;  %v494_v29 = vmul.f32 %v480_v46, %v467_v15  ;;  %v495_v38 = vmul.f32 %v484_v20, %v466_v7  ;;  %1341 = vmatpush1.bf16.msra.mxu1 %v1340_v9  ;;  %v1115_v46 = vld [vmem:[%s1982_s5] sm:$0xf] }
 0x183   :  { %1325 = vmatpush1.bf16.msra.mxu0 %v1324_v50  ;;  %v750_v9 = vld [vmem:[%s1980_s6] ss:$8 sm:$0xf] }
 0x184   :  { %v1344_v45 = vpack.c.bf16 %v495_v38, %v451_v48  ;;  %v504_v10 = vpop.permute.xlu1 %503  ;;  %v502_v13 = vpop.permute.xlu0 %501  ;;  %v1326_v63 = vpack.c.bf16 %v494_v29, %v450_v6  ;;  %v1342_v14 = vpack.c.bf16 %v496_v37, %v452_v58  ;;  %v759_v61 = vrot.slane %v750_v9, %v1580_v40 }
 0x185   :  { %v512_v26 = vsel %vm509_vm9, %v502_v13, %v504_v10  ;;  %v755_v32 = vrot.slane %v750_v9, %v1578_v39  ;;  %v767_v48 = vrot.slane %v750_v9, %v1551_v19  ;;  %v805_v37 = vrot.slane %v1305_v8, %v1582_v41 }
 0x186   :  { %1327 = vmatprep.subr.bf16.mxu0 %v1326_v63  ;;  %1343 = vmatprep.subr.bf16.mxu1 %v1342_v14  ;;  %v537_v60 = vmul.f32 %v520_v21, %v512_v26  ;;  %v797_v38 = vrot.slane %v1305_v8, %v1578_v39  ;;  %v1308_v8 = vld [vmem:[%s1980_s6 + $0x5] ss:$8 sm:$0xf] }
 0x187   :  { %1329 = vmatpush1.bf16.msra.mxu0 %v1328_v35  ;;  %1345 = vmatpush1.bf16.msra.mxu1 %v1344_v45 }
 0x188   :  { %v508_v53 = vpop.permute.xlu1 %507  ;;  %v506_v28 = vpop.permute.xlu0 %505 }
 0x189   :  { %v513_v47 = vsel %vm509_vm9, %v508_v53, %v502_v13  ;;  %v510_v27 = vsel %vm509_vm9, %v506_v28, %v508_v53  ;;  %v511_v36 = vsel %vm509_vm9, %v504_v10, %v506_v28  ;;  %v763_v13 = vrot.slane %v750_v9, %v1582_v41 }
 0x18a   :  { %v540_v56 = vmul.f32 %v532_v43, %v513_v47  ;;  %v538_v42 = vmul.f32 %v524_v23, %v511_v36  ;;  %v539_v52 = vmul.f32 %v528_v22, %v510_v27 }
 0x18c   :  { %608 = vmatprep.subr.mxu0 %v538_v42  ;;  %679 = vmatprep.subr.mxu1 %v540_v56 }
 0x18d   :  { %609 = vmatpush1.msra.mxu0 %v537_v60  ;;  %680 = vmatpush1.msra.mxu1 %v539_v52 }
 0x18e   :  { %1303 = vmatmul.mubr.msk.f32.vlgmr.msra.gmra.mrb[2].mxu0 %vm588_vm10, %v545_v51  ;;  %1304 = vmatmul.mubr.msk.f32.vlgmr.msra.gmra.mrb[2].mxu1 %vm588_vm10, %v545_v51 }
 0x18f   :  { %1188 = vmatprep.mubr.f32.mxu0 %v1391_v2  ;;  %1259 = vmatprep.mubr.f32.mxu1 %v1391_v2 }
 0x199   :  { %v586_v62 = vpop.permute.xlu0 %585 }
 0x261   :  { %v658_v54 = vpop.f32.mrb[2].mxu0  ;;  %v729_v12 = vpop.f32.mrb[2].mxu1 }
 0x262   :  { %v659_v17 = vadd.f32 %v658_v54, %v586_v62  ;;  %v730_v25 = vadd.f32 %v729_v12, %v586_v62  ;;  %v660_v30 = vpop.f32.mrb[3].mxu0  ;;  %v731_v31 = vpop.f32.mrb[3].mxu1  ;;  %v1306_v54 = vld [vmem:[%s1980_s6 + $0x2] ss:$8 sm:$0xf] }
 0x263   :  { %v661_v11 = vadd.f32 %v660_v30, %v586_v62  ;;  %v732_v2 = vadd.f32 %v731_v31, %v586_v62  ;;  %v1307_v12 = vld [vmem:[%s1980_s6 + $0x3] ss:$8 sm:$0xf]  ;;  %v843_v30 = vrot.slane %v1306_v54, %v1580_v40 }
 0x264   :  { %v1763_v44 = vmax.f32 %v659_v17, 0.0  ;;  %v1765_v55 = vmax.f32 %v730_v25, 0.0  ;;  %v885_v31 = vrot.slane %v1307_v12, %v1580_v40  ;;  %v881_v9 = vrot.slane %v1307_v12, %v1578_v39 }
 0x265   :  { %v1771_v24 = vmax.f32 %v661_v11, 0.0  ;;  %v1777_v34 = vmax.f32 %v732_v2, 0.0  ;;  %v839_v2 = vrot.slane %v1306_v54, %v1578_v39 }
 0x266   :  { %742 = vrot.lane.b32.xlu0 %v1765_v55, %s1392_s0  ;;  %738 = vrot.lane.b32.xlu1 %v1763_v44, %s1392_s0 }
 0x26a   :  { %780 = vrot.lane.b32.xlu0 %v1763_v44, %s1393_s1  ;;  %740 = vrot.lane.b32.xlu1 %v1771_v24, %s1392_s0 }
 0x26e   :  { %784 = vrot.lane.b32.xlu0 %v1765_v55, %s1393_s1  ;;  %744 = vrot.lane.b32.xlu1 %v1777_v34, %s1392_s0 }
 0x272   :  { %822 = vrot.lane.b32.xlu0 %v1763_v44, %s1394_s30  ;;  %782 = vrot.lane.b32.xlu1 %v1771_v24, %s1393_s1 }
 0x276   :  { %826 = vrot.lane.b32.xlu0 %v1765_v55, %s1394_s30  ;;  %786 = vrot.lane.b32.xlu1 %v1777_v34, %s1393_s1 }
 0x27a   :  { %864 = vrot.lane.b32.xlu0 %v1763_v44, %s1395_s8  ;;  %824 = vrot.lane.b32.xlu1 %v1771_v24, %s1394_s30 }
 0x27e   :  { %868 = vrot.lane.b32.xlu0 %v1765_v55, %s1395_s8  ;;  %828 = vrot.lane.b32.xlu1 %v1777_v34, %s1394_s30 }
 0x282   :  { %910 = vrot.lane.b32.xlu0 %v1763_v44, %s1396_s9  ;;  %866 = vrot.lane.b32.xlu1 %v1771_v24, %s1395_s8 }
 0x286   :  { %914 = vrot.lane.b32.xlu0 %v1765_v55, %s1396_s9  ;;  %870 = vrot.lane.b32.xlu1 %v1777_v34, %s1395_s8 }
 0x28a   :  { %952 = vrot.lane.b32.xlu0 %v1763_v44, %s1397_s10  ;;  %912 = vrot.lane.b32.xlu1 %v1771_v24, %s1396_s9 }
 0x28e   :  { %956 = vrot.lane.b32.xlu0 %v1765_v55, %s1397_s10  ;;  %916 = vrot.lane.b32.xlu1 %v1777_v34, %s1396_s9 }
 0x292   :  { %994 = vrot.lane.b32.xlu0 %v1763_v44, %s1398_s11  ;;  %954 = vrot.lane.b32.xlu1 %v1771_v24, %s1397_s10 }
 0x296   :  { %998 = vrot.lane.b32.xlu0 %v1765_v55, %s1398_s11  ;;  %958 = vrot.lane.b32.xlu1 %v1777_v34, %s1397_s10 }
 0x29a   :  { %1036 = vrot.lane.b32.xlu0 %v1763_v44, %s1400_s12  ;;  %996 = vrot.lane.b32.xlu1 %v1771_v24, %s1398_s11 }
 0x29e   :  { %1040 = vrot.lane.b32.xlu0 %v1765_v55, %s1400_s12  ;;  %1000 = vrot.lane.b32.xlu1 %v1777_v34, %s1398_s11 }
 0x2a2   :  { %1118 = vperm.xlu0 %1388, %v1115_v46   ;;  %1038 = vrot.lane.b32.xlu1 %v1771_v24, %s1400_s12 }
 0x2a6   :  { %1042 = vrot.lane.b32.xlu1 %v1777_v34, %s1400_s12 }
 0x2d8   :  { %v743_v20 = vpop.permute.xlu0 %742  ;;  %v739_v50 = vpop.permute.xlu1 %738 }
 0x2dc   :  { %v781_v49 = vpop.permute.xlu0 %780  ;;  %v741_v57 = vpop.permute.xlu1 %740 }
 0x2dd   :  { %v748_v33 = vsel %vm198_vm2, %v739_v50, %v741_v57  ;;  %v747_v35 = vsel %vm198_vm2, %v741_v57, %v743_v20 }
 0x2de   :  { %v773_v18 = vmul.f32 %v759_v61, %v748_v33  ;;  %v774_v56 = vmul.f32 %v763_v13, %v747_v35  ;;  %v847_v33 = vrot.slane %v1306_v54, %v1582_v41  ;;  %v931_v13 = vrot.slane %v1308_v8, %v1580_v40 }
 0x2e0   :  { %v785_v58 = vpop.permute.xlu0 %784  ;;  %v745_v6 = vpop.permute.xlu1 %744 }
 0x2e1   :  { %v746_v63 = vsel %vm198_vm2, %v743_v20, %v745_v6  ;;  %v749_v14 = vsel %vm198_vm2, %v745_v6, %v739_v50  ;;  %v851_v50 = vrot.slane %v1306_v54, %v1551_v19 }
 0x2e2   :  { %v772_v28 = vmul.f32 %v755_v32, %v749_v14  ;;  %v775_v47 = vmul.f32 %v767_v48, %v746_v63 }
 0x2e4   :  { %v823_v7 = vpop.permute.xlu0 %822  ;;  %v783_v15 = vpop.permute.xlu1 %782 }
 0x2e5   :  { %v790_v29 = vsel %vm241_vm3, %v781_v49, %v783_v15  ;;  %v789_v45 = vsel %vm241_vm3, %v783_v15, %v785_v58 }
 0x2e6   :  { %v815_v10 = vmul.f32 %v801_v5, %v790_v29  ;;  %v816_v21 = vmul.f32 %v805_v37, %v789_v45  ;;  %v893_v5 = vrot.slane %v1307_v12, %v1551_v19 }
 0x2e8   :  { %v827_v43 = vpop.permute.xlu0 %826  ;;  %v787_v23 = vpop.permute.xlu1 %786  ;;  %v1346_v22 = vpack.c.bf16 %v815_v10, %v773_v18  ;;  %v1364_v62 = vpack.c.bf16 %v816_v21, %v774_v56  ;;  %v927_v18 = vrot.slane %v1308_v8, %v1578_v39 }
 0x2e9   :  { %v788_v26 = vsel %vm241_vm3, %v785_v58, %v787_v23  ;;  %v791_v53 = vsel %vm241_vm3, %v787_v23, %v781_v49  ;;  %v889_v49 = vrot.slane %v1307_v12, %v1582_v41 }
 0x2ea   :  { %v814_v27 = vmul.f32 %v797_v38, %v791_v53  ;;  %v817_v36 = vmul.f32 %v809_v59, %v788_v26  ;;  %1347 = vmatprep.subr.bf16.mxu0 %v1346_v22 }
 0x2ec   :  { %v1348_v42 = vpack.c.bf16 %v814_v27, %v772_v28  ;;  %v865_v52 = vpop.permute.xlu0 %864  ;;  %v825_v60 = vpop.permute.xlu1 %824  ;;  %v1362_v51 = vpack.c.bf16 %v817_v36, %v775_v47  ;;  %v935_v27 = vrot.slane %v1308_v8, %v1582_v41 }
 0x2ed   :  { %v832_v11 = vsel %vm285_vm4, %v823_v7, %v825_v60  ;;  %v831_v48 = vsel %vm285_vm4, %v825_v60, %v827_v43 }
 0x2ee   :  { %1349 = vmatpush1.bf16.msra.mxu0 %v1348_v42  ;;  %1363 = vmatprep.subr.bf16.mxu1 %v1362_v51  ;;  %v857_v58 = vmul.f32 %v843_v30, %v832_v11  ;;  %v939_v42 = vrot.slane %v1308_v8, %v1551_v19 }
 0x2ef   :  { %1365 = vmatpush1.bf16.msra.mxu1 %v1364_v62 }
 0x2f0   :  { %v869_v17 = vpop.permute.xlu0 %868  ;;  %v829_v25 = vpop.permute.xlu1 %828 }
 0x2f1   :  { %v830_v32 = vsel %vm285_vm4, %v827_v43, %v829_v25  ;;  %v833_v15 = vsel %vm285_vm4, %v829_v25, %v823_v7  ;;  %v858_v43 = vmul.f32 %v847_v33, %v831_v48 }
 0x2f2   :  { %v856_v63 = vmul.f32 %v839_v2, %v833_v15  ;;  %v859_v14 = vmul.f32 %v851_v50, %v830_v32  ;;  %v1310_v2 = vld [vmem:[%s1980_s6 + $0x7] ss:$8 sm:$0xf] }
 0x2f3   :  { %v1019_v33 = vrot.slane %v1310_v2, %v1582_v41  ;;  %v1023_v32 = vrot.slane %v1310_v2, %v1551_v19 }
 0x2f4   :  { %v911_v46 = vpop.permute.xlu0 %910  ;;  %v867_v20 = vpop.permute.xlu1 %866 }
 0x2f5   :  { %v874_v57 = vsel %vm329_vm5, %v865_v52, %v867_v20  ;;  %v873_v6 = vsel %vm329_vm5, %v867_v20, %v869_v17 }
 0x2f6   :  { %v899_v61 = vmul.f32 %v885_v31, %v874_v57  ;;  %v900_v45 = vmul.f32 %v889_v49, %v873_v6  ;;  %v1011_v49 = vrot.slane %v1310_v2, %v1578_v39 }
 0x2f8   :  { %v915_v37 = vpop.permute.xlu0 %914  ;;  %v871_v29 = vpop.permute.xlu1 %870  ;;  %v1350_v38 = vpack.c.bf16 %v899_v61, %v857_v58  ;;  %v1368_v53 = vpack.c.bf16 %v900_v45, %v858_v43 }
 0x2f9   :  { %v872_v10 = vsel %vm329_vm5, %v869_v17, %v871_v29  ;;  %v875_v59 = vsel %vm329_vm5, %v871_v29, %v865_v52 }
 0x2fa   :  { %v898_v7 = vmul.f32 %v881_v9, %v875_v59  ;;  %v901_v35 = vmul.f32 %v893_v5, %v872_v10  ;;  %1351 = vmatprep.subr.bf16.mxu0 %v1350_v38 }
 0x2fc   :  { %v1352_v23 = vpack.c.bf16 %v898_v7, %v856_v63  ;;  %v953_v22 = vpop.permute.xlu0 %952  ;;  %v913_v21 = vpop.permute.xlu1 %912  ;;  %v1366_v26 = vpack.c.bf16 %v901_v35, %v859_v14 }
 0x2fd   :  { %v919_v28 = vsel %vm377_vm6, %v913_v21, %v915_v37  ;;  %v920_v47 = vsel %vm377_vm6, %v911_v46, %v913_v21 }
 0x2fe   :  { %v944_v36 = vmul.f32 %v927_v18, %v920_v47  ;;  %v945_v56 = vmul.f32 %v931_v13, %v919_v28  ;;  %1353 = vmatpush1.bf16.msra.mxu0 %v1352_v23  ;;  %1367 = vmatprep.subr.bf16.mxu1 %v1366_v26  ;;  %v1311_v18 = vld [vmem:[%s1980_s6 + $0x20] ss:$8 sm:$0xf] }
 0x2ff   :  { %1369 = vmatpush1.bf16.msra.mxu1 %v1368_v53  ;;  %v1053_v35 = vrot.slane %v1311_v18, %v1578_v39  ;;  %v1057_v43 = vrot.slane %v1311_v18, %v1580_v40 }
 0x300   :  { %v1356_v52 = vpack.c.bf16 %v944_v36, %v1763_v44  ;;  %v957_v60 = vpop.permute.xlu0 %956  ;;  %v917_v51 = vpop.permute.xlu1 %916  ;;  %v1354_v62 = vpack.c.bf16 %v945_v56, %v1771_v24  ;;  %v1309_v24 = vld [vmem:[%s1980_s6 + $0x6] ss:$8 sm:$0xf] }
 0x301   :  { %v918_v54 = vsel %vm377_vm6, %v915_v37, %v917_v51  ;;  %v921_v12 = vsel %vm377_vm6, %v917_v51, %v911_v46  ;;  %v969_v50 = vrot.slane %v1309_v24, %v1578_v39  ;;  %v977_v8 = vrot.slane %v1309_v24, %v1582_v41 }
 0x302   :  { %v946_v17 = vmul.f32 %v935_v27, %v918_v54  ;;  %v947_v25 = vmul.f32 %v939_v42, %v921_v12  ;;  %1355 = vmatprep.subr.bf16.mxu0 %v1354_v62  ;;  %v981_v58 = vrot.slane %v1309_v24, %v1551_v19 }
 0x303   :  { %1357 = vmatpush1.bf16.msra.mxu0 %v1356_v52  ;;  %v1065_v52 = vrot.slane %v1311_v18, %v1551_v19 }
 0x304   :  { %v1372_v30 = vpack.c.bf16 %v946_v17, %v1765_v55  ;;  %v995_v31 = vpop.permute.xlu0 %994  ;;  %v955_v11 = vpop.permute.xlu1 %954  ;;  %v1370_v44 = vpack.c.bf16 %v947_v25, %v1777_v34  ;;  %v973_v55 = vrot.slane %v1309_v24, %v1580_v40  ;;  %v1015_v34 = vrot.slane %v1310_v2, %v1580_v40 }
 0x305   :  { %v961_v57 = vsel %vm421_vm7, %v955_v11, %v957_v60  ;;  %v962_v9 = vsel %vm421_vm7, %v953_v22, %v955_v11  ;;  %v1061_v40 = vrot.slane %v1311_v18, %v1582_v41 }
 0x306   :  { %1371 = vmatprep.subr.bf16.mxu1 %v1370_v44  ;;  %v986_v15 = vmul.f32 %v969_v50, %v962_v9  ;;  %v987_v48 = vmul.f32 %v973_v55, %v961_v57 }
 0x307   :  { %1373 = vmatpush1.bf16.msra.mxu1 %v1372_v30 }
 0x308   :  { %v999_v46 = vpop.permute.xlu0 %998  ;;  %v959_v20 = vpop.permute.xlu1 %958 }
 0x309   :  { %v960_v45 = vsel %vm421_vm7, %v957_v60, %v959_v20  ;;  %v963_v10 = vsel %vm421_vm7, %v959_v20, %v953_v22  ;;  %v1078_v60 = vld [vmem:[%s1983_s4] sm:$0xf] }
 0x30a   :  { %v988_v23 = vmul.f32 %v977_v8, %v960_v45  ;;  %v989_v21 = vmul.f32 %v981_v58, %v963_v10 }
 0x30c   :  { %v997_v6 = vpop.permute.xlu1 %996  ;;  %v1037_v37 = vpop.permute.xlu0 %1036 }
 0x30d   :  { %v1003_v61 = vsel %vm465_vm8, %v997_v6, %v999_v46  ;;  %v1004_v5 = vsel %vm465_vm8, %v995_v31, %v997_v6 }
 0x30e   :  { %v1028_v29 = vmul.f32 %v1011_v49, %v1004_v5  ;;  %v1029_v38 = vmul.f32 %v1015_v34, %v1003_v61 }
 0x310   :  { %v1360_v59 = vpack.c.bf16 %v1028_v29, %v986_v15  ;;  %v1001_v13 = vpop.permute.xlu1 %1000  ;;  %v1358_v63 = vpack.c.bf16 %v1029_v38, %v987_v48  ;;  %v1041_v22 = vpop.permute.xlu0 %1040 }
 0x311   :  { %v1002_v14 = vsel %vm465_vm8, %v999_v46, %v1001_v13  ;;  %v1005_v7 = vsel %vm465_vm8, %v1001_v13, %v995_v31 }
 0x312   :  { %v1030_v26 = vmul.f32 %v1019_v33, %v1002_v14  ;;  %v1031_v53 = vmul.f32 %v1023_v32, %v1005_v7  ;;  %1359 = vmatprep.subr.bf16.mxu0 %v1358_v63 }
 0x313   :  { %1361 = vmatpush1.bf16.msra.mxu0 %v1360_v59 }
 0x314   :  { %v1376_v28 = vpack.c.bf16 %v1030_v26, %v988_v23  ;;  %v1039_v47 = vpop.permute.xlu1 %1038  ;;  %v1374_v27 = vpack.c.bf16 %v1031_v53, %v989_v21 }
 0x315   :  { %v1045_v36 = vsel %vm509_vm9, %v1039_v47, %v1041_v22  ;;  %v1046_v56 = vsel %vm509_vm9, %v1037_v37, %v1039_v47 }
 0x316   :  { %v1070_v42 = vmul.f32 %v1053_v35, %v1046_v56  ;;  %v1071_v39 = vmul.f32 %v1057_v43, %v1045_v36  ;;  %1375 = vmatprep.subr.bf16.mxu1 %v1374_v27 }
 0x317   :  { %1377 = vmatpush1.bf16.msra.mxu1 %v1376_v28 }
 0x318   :  { %1140 = vmatprep.subr.mxu0 %v1071_v39  ;;  %v1043_v51 = vpop.permute.xlu1 %1042 }
 0x319   :  { %v1044_v62 = vsel %vm509_vm9, %v1041_v22, %v1043_v51  ;;  %v1047_v54 = vsel %vm509_vm9, %v1043_v51, %v1037_v37  ;;  %1141 = vmatpush1.msra.mxu0 %v1070_v42 }
 0x31a   :  { %v1072_v12 = vmul.f32 %v1061_v40, %v1044_v62  ;;  %v1073_v17 = vmul.f32 %v1065_v52, %v1047_v54  ;;  %1312 = vmatmul.mubr.msk.f32.vlgmr.msra.gmra.mrb[4].mxu0 %vm588_vm10, %v1078_v60 }
 0x31c   :  { %1211 = vmatprep.subr.mxu1 %v1073_v17 }
 0x31d   :  { %1212 = vmatpush1.msra.mxu1 %v1072_v12 }
 0x31e   :  { %1313 = vmatmul.mubr.msk.f32.vlgmr.msra.gmra.mrb[4].mxu1 %vm588_vm10, %v1078_v60 }
 0x321   :  { %v1119_v19 = vpop.permute.xlu0 %1118 }
 0x3ed   :  { %v1190_v41 = vpop.f32.mrb[4].mxu0 }
 0x3ee   :  { %v1191_v25 = vadd.f32 %v1190_v41, %v1119_v19  ;;  %v1192_v30 = vpop.f32.mrb[5].mxu0 }
 0x3ef   :  { %v1193_v31 = vadd.f32 %v1192_v30, %v1119_v19 }
 0x3f0   :  { %v1268_v11 = vadd.f32 %v1191_v25, %v1444_v0 }
 0x3f1   :  { %v1269_v44 = vadd.f32 %v1193_v31, %v1455_v3  ;;  %v1261_v16 = vpop.f32.mrb[4].mxu1 }
 0x3f2   :  { %v1272_v24 = vmax.f32 %v1268_v11, 0.0  ;;  %v1262_v2 = vadd.f32 %v1261_v16, %v1119_v19  ;;  %v1263_v46 = vpop.f32.mrb[5].mxu1 }
 0x3f3   :  { %v1273_v20 = vmax.f32 %v1269_v44, 0.0  ;;  %v1264_v50 = vadd.f32 %v1263_v46, %v1119_v19 }
 0x3f4   :  { %v1270_v55 = vadd.f32 %v1262_v2, %v1449_v1 }
 0x3f5   :  { %v1280_v49 = vcombine.low %v1272_v24, %v1273_v20  ;;  %v1271_v34 = vadd.f32 %v1264_v50, %v1459_v4 }
 0x3f6   :  { %v1274_v57 = vmax.f32 %v1270_v55, 0.0 }
 0x3f7   :  { %1284 = vst [vmem:[%s1984_s7] sm:$0xff] %v1280_v49  ;;  %v1275_v9 = vmax.f32 %v1271_v34, 0.0 }
 0x3f9   :  { %v1281_v0 = vcombine.low %v1274_v57, %v1275_v9 }
 0x3fb   :  { %1285 = vst [vmem:[%s1984_s7 + $0x8] sm:$0xff] %v1281_v0 }

</bundles_post_ra>
